<compile_context>
chip_gen: v7x
topology: tpu7x:2x2x1
jax: 0.10.0
libtpu: 0.0.40
codegen_flags: <defaults>
</compile_context>

<pallas_src>
import jax
import jax.numpy as jnp
from jax.experimental import pallas as pl
from jax.experimental.pallas import tpu as pltpu


def _make_dma_copy_kernel(num_arrays: int):
    """Build a kernel that copies `num_arrays` refs HBM->HBM via async DMA.

    Kernel arg layout: (in_ref_0..in_ref_{n-1}, out_ref_0..out_ref_{n-1}, dma_sems).
    """

    def kernel(*refs):
        in_refs = refs[:num_arrays]
        out_refs = refs[num_arrays:2 * num_arrays]
        sems = refs[2 * num_arrays]
        copies = [
            pltpu.make_async_copy(in_refs[i], out_refs[i], sems.at[i])
            for i in range(num_arrays)
        ]
        # Issue every DMA first so they all overlap on the DMA engine ...
        for c in copies:
            c.start()
        # ... then drain completions.
        for c in copies:
            c.wait()

    return kernel


def _fused_identity_copy(gaussians):
    """Bit-exact copy of every attribute in ONE pallas_call, pure HBM->HBM DMA."""
    names = list(gaussians.keys())
    if not names:
        return {}
    arrays = [gaussians[n] for n in names]
    n = len(arrays)

    outs = pl.pallas_call(
        _make_dma_copy_kernel(n),
        out_shape=tuple(jax.ShapeDtypeStruct(a.shape, a.dtype) for a in arrays),
        # pl.ANY => kernel receives raw (HBM) refs, no automatic VMEM tiling/DMA.
        in_specs=[pl.BlockSpec(memory_space=pl.ANY) for _ in range(n)],
        out_specs=tuple(pl.BlockSpec(memory_space=pl.ANY) for _ in range(n)),
        scratch_shapes=[pltpu.SemaphoreType.DMA((n,))],
    )(*arrays)

    if not isinstance(outs, (list, tuple)):
        outs = (outs,)
    return {name: out for name, out in zip(names, outs)}


def identity_deform_forward(gaussians, iteration=None, camera=None,
                            compute_loss=True, materialize=False):
    """Pallas equivalent of Identity.forward: returns (gaussians, {}).

    Default (`materialize=False`): pure pass-through — no kernel, no copy (the
    fastest possible identity).  `materialize=True` routes the attributes through
    one fused HBM->HBM DMA copy kernel (bit-exact), used here to exercise Pallas.
    """
    if not materialize:
        return gaussians, {}
    return _fused_identity_copy(gaussians), {}


if __name__ == "__main__":
    key = jax.random.PRNGKey(0)
    k_xyz, k_rot, k_scale, k_opac, k_feat = jax.random.split(key, 5)

    num_gaussians = 64  # small synthetic gaussian cloud
    gaussians = {
        "xyz": jax.random.normal(k_xyz, (num_gaussians, 3), dtype=jnp.float32),
        "rotation": jax.random.normal(k_rot, (num_gaussians, 4), dtype=jnp.float32),
        "scaling": jax.random.normal(k_scale, (num_gaussians, 3), dtype=jnp.float32),
        "opacity": jax.random.normal(k_opac, (num_gaussians, 1), dtype=jnp.float32),
        "features": jax.random.normal(k_feat, (num_gaussians, 16), dtype=jnp.float32),
    }

    # 1) Default performance path: true identity, zero copies, zero kernel launches.
    out0, loss0 = identity_deform_forward(gaussians, iteration=0, camera=None)
    assert loss0 == {}
    assert all(out0[k] is gaussians[k] for k in gaussians)

    # 2) Explicit-copy path: one pallas_call, per-attribute HBM->HBM async DMA,
    #    no concatenate / pad / slice-back, no VMEM staging.
    out1, loss1 = identity_deform_forward(
        gaussians, iteration=0, camera=None, compute_loss=True, materialize=True
    )
    jax.block_until_ready(out1)

    assert loss1 == {}
    assert list(out1.keys()) == list(gaussians.keys())
    for name, arr in gaussians.items():
        assert out1[name].shape == arr.shape
        assert out1[name].dtype == arr.dtype
        assert bool(jnp.array_equal(out1[name], arr))

    print("KERNEL_OK")
</pallas_src>

<mosaic_0001>
module attributes {stable_mosaic.version = 11 : i64} {
  func.func @kernel(%arg0: memref<64x3xf32, #tpu.memory_space<any>>, %arg1: memref<64x4xf32, #tpu.memory_space<any>>, %arg2: memref<64x3xf32, #tpu.memory_space<any>>, %arg3: memref<64x1xf32, #tpu.memory_space<any>>, %arg4: memref<64x16xf32, #tpu.memory_space<any>>, %arg5: memref<64x3xf32, #tpu.memory_space<any>>, %arg6: memref<64x4xf32, #tpu.memory_space<any>>, %arg7: memref<64x3xf32, #tpu.memory_space<any>>, %arg8: memref<64x1xf32, #tpu.memory_space<any>>, %arg9: memref<64x16xf32, #tpu.memory_space<any>>, %arg10: memref<5x!tpu.dma_semaphore, #tpu.memory_space<semaphore_mem>>) attributes {dimension_semantics = [], scalar_prefetch = 0 : i64, scratch_operands = 1 : i64, tpu.core_type = #tpu.core_type<tc>} {
    %c0_i32 = arith.constant 0 : i32
    %0 = tpu.memref_slice %arg10[%c0_i32] : memref<5x!tpu.dma_semaphore, #tpu.memory_space<semaphore_mem>> -> memref<1x!tpu.dma_semaphore, #tpu.memory_space<semaphore_mem>>
    %1 = tpu.memref_squeeze %0 : memref<1x!tpu.dma_semaphore, #tpu.memory_space<semaphore_mem>> -> memref<!tpu.dma_semaphore, #tpu.memory_space<semaphore_mem>>
    tpu.enqueue_dma source(%arg0 : memref<64x3xf32, #tpu.memory_space<any>>) target(%arg5 : memref<64x3xf32, #tpu.memory_space<any>>) target_semaphore(%1 : memref<!tpu.dma_semaphore, #tpu.memory_space<semaphore_mem>>)
    %c1_i32 = arith.constant 1 : i32
    %2 = tpu.memref_slice %arg10[%c1_i32] : memref<5x!tpu.dma_semaphore, #tpu.memory_space<semaphore_mem>> -> memref<1x!tpu.dma_semaphore, #tpu.memory_space<semaphore_mem>>
    %3 = tpu.memref_squeeze %2 : memref<1x!tpu.dma_semaphore, #tpu.memory_space<semaphore_mem>> -> memref<!tpu.dma_semaphore, #tpu.memory_space<semaphore_mem>>
    tpu.enqueue_dma source(%arg1 : memref<64x4xf32, #tpu.memory_space<any>>) target(%arg6 : memref<64x4xf32, #tpu.memory_space<any>>) target_semaphore(%3 : memref<!tpu.dma_semaphore, #tpu.memory_space<semaphore_mem>>)
    %c2_i32 = arith.constant 2 : i32
    %4 = tpu.memref_slice %arg10[%c2_i32] : memref<5x!tpu.dma_semaphore, #tpu.memory_space<semaphore_mem>> -> memref<1x!tpu.dma_semaphore, #tpu.memory_space<semaphore_mem>>
    %5 = tpu.memref_squeeze %4 : memref<1x!tpu.dma_semaphore, #tpu.memory_space<semaphore_mem>> -> memref<!tpu.dma_semaphore, #tpu.memory_space<semaphore_mem>>
    tpu.enqueue_dma source(%arg2 : memref<64x3xf32, #tpu.memory_space<any>>) target(%arg7 : memref<64x3xf32, #tpu.memory_space<any>>) target_semaphore(%5 : memref<!tpu.dma_semaphore, #tpu.memory_space<semaphore_mem>>)
    %c3_i32 = arith.constant 3 : i32
    %6 = tpu.memref_slice %arg10[%c3_i32] : memref<5x!tpu.dma_semaphore, #tpu.memory_space<semaphore_mem>> -> memref<1x!tpu.dma_semaphore, #tpu.memory_space<semaphore_mem>>
    %7 = tpu.memref_squeeze %6 : memref<1x!tpu.dma_semaphore, #tpu.memory_space<semaphore_mem>> -> memref<!tpu.dma_semaphore, #tpu.memory_space<semaphore_mem>>
    tpu.enqueue_dma source(%arg3 : memref<64x1xf32, #tpu.memory_space<any>>) target(%arg8 : memref<64x1xf32, #tpu.memory_space<any>>) target_semaphore(%7 : memref<!tpu.dma_semaphore, #tpu.memory_space<semaphore_mem>>)
    %c4_i32 = arith.constant 4 : i32
    %8 = tpu.memref_slice %arg10[%c4_i32] : memref<5x!tpu.dma_semaphore, #tpu.memory_space<semaphore_mem>> -> memref<1x!tpu.dma_semaphore, #tpu.memory_space<semaphore_mem>>
    %9 = tpu.memref_squeeze %8 : memref<1x!tpu.dma_semaphore, #tpu.memory_space<semaphore_mem>> -> memref<!tpu.dma_semaphore, #tpu.memory_space<semaphore_mem>>
    tpu.enqueue_dma source(%arg4 : memref<64x16xf32, #tpu.memory_space<any>>) target(%arg9 : memref<64x16xf32, #tpu.memory_space<any>>) target_semaphore(%9 : memref<!tpu.dma_semaphore, #tpu.memory_space<semaphore_mem>>)
    %c0_i32_0 = arith.constant 0 : i32
    %10 = tpu.memref_slice %arg10[%c0_i32_0] : memref<5x!tpu.dma_semaphore, #tpu.memory_space<semaphore_mem>> -> memref<1x!tpu.dma_semaphore, #tpu.memory_space<semaphore_mem>>
    %11 = tpu.memref_squeeze %10 : memref<1x!tpu.dma_semaphore, #tpu.memory_space<semaphore_mem>> -> memref<!tpu.dma_semaphore, #tpu.memory_space<semaphore_mem>>
    tpu.wait_dma2 semaphore(%11 : memref<!tpu.dma_semaphore, #tpu.memory_space<semaphore_mem>>) src(%arg0 : memref<64x3xf32, #tpu.memory_space<any>>) dst(%arg5 : memref<64x3xf32, #tpu.memory_space<any>>)
    %c1_i32_1 = arith.constant 1 : i32
    %12 = tpu.memref_slice %arg10[%c1_i32_1] : memref<5x!tpu.dma_semaphore, #tpu.memory_space<semaphore_mem>> -> memref<1x!tpu.dma_semaphore, #tpu.memory_space<semaphore_mem>>
    %13 = tpu.memref_squeeze %12 : memref<1x!tpu.dma_semaphore, #tpu.memory_space<semaphore_mem>> -> memref<!tpu.dma_semaphore, #tpu.memory_space<semaphore_mem>>
    tpu.wait_dma2 semaphore(%13 : memref<!tpu.dma_semaphore, #tpu.memory_space<semaphore_mem>>) src(%arg1 : memref<64x4xf32, #tpu.memory_space<any>>) dst(%arg6 : memref<64x4xf32, #tpu.memory_space<any>>)
    %c2_i32_2 = arith.constant 2 : i32
    %14 = tpu.memref_slice %arg10[%c2_i32_2] : memref<5x!tpu.dma_semaphore, #tpu.memory_space<semaphore_mem>> -> memref<1x!tpu.dma_semaphore, #tpu.memory_space<semaphore_mem>>
    %15 = tpu.memref_squeeze %14 : memref<1x!tpu.dma_semaphore, #tpu.memory_space<semaphore_mem>> -> memref<!tpu.dma_semaphore, #tpu.memory_space<semaphore_mem>>
    tpu.wait_dma2 semaphore(%15 : memref<!tpu.dma_semaphore, #tpu.memory_space<semaphore_mem>>) src(%arg2 : memref<64x3xf32, #tpu.memory_space<any>>) dst(%arg7 : memref<64x3xf32, #tpu.memory_space<any>>)
    %c3_i32_3 = arith.constant 3 : i32
    %16 = tpu.memref_slice %arg10[%c3_i32_3] : memref<5x!tpu.dma_semaphore, #tpu.memory_space<semaphore_mem>> -> memref<1x!tpu.dma_semaphore, #tpu.memory_space<semaphore_mem>>
    %17 = tpu.memref_squeeze %16 : memref<1x!tpu.dma_semaphore, #tpu.memory_space<semaphore_mem>> -> memref<!tpu.dma_semaphore, #tpu.memory_space<semaphore_mem>>
    tpu.wait_dma2 semaphore(%17 : memref<!tpu.dma_semaphore, #tpu.memory_space<semaphore_mem>>) src(%arg3 : memref<64x1xf32, #tpu.memory_space<any>>) dst(%arg8 : memref<64x1xf32, #tpu.memory_space<any>>)
    %c4_i32_4 = arith.constant 4 : i32
    %18 = tpu.memref_slice %arg10[%c4_i32_4] : memref<5x!tpu.dma_semaphore, #tpu.memory_space<semaphore_mem>> -> memref<1x!tpu.dma_semaphore, #tpu.memory_space<semaphore_mem>>
    %19 = tpu.memref_squeeze %18 : memref<1x!tpu.dma_semaphore, #tpu.memory_space<semaphore_mem>> -> memref<!tpu.dma_semaphore, #tpu.memory_space<semaphore_mem>>
    tpu.wait_dma2 semaphore(%19 : memref<!tpu.dma_semaphore, #tpu.memory_space<semaphore_mem>>) src(%arg4 : memref<64x16xf32, #tpu.memory_space<any>>) dst(%arg9 : memref<64x16xf32, #tpu.memory_space<any>>)
    return
  }
}

</mosaic_0001>

<bundles_post_ra>
// kernel: tpu_custom_call.1
= control target key start
LH: loop header
LB: loop body
LE: loop exit
PB: predicated region body
PF: predicated region fallthrough
CT: control target
= control target key end

     0   :  { %s689_s0 = inlined_call_operand.vmem [shape: f32[64,3], index: 0, kind: input, shape index: {}]   ;;  %s690_s1 = inlined_call_operand.vmem [shape: f32[64,4], index: 1, kind: input, shape index: {}]   ;;  %s691_s2 = inlined_call_operand.vmem [shape: f32[64,3], index: 2, kind: input, shape index: {}]   ;;  %s692_s3 = inlined_call_operand.vmem [shape: f32[64,1], index: 3, kind: input, shape index: {}]   ;;  %s693_s4 = inlined_call_operand.vmem [shape: f32[64,16], index: 4, kind: input, shape index: {}]   ;;  %s694_s5 = inlined_call_operand.vmem [shape: f32[64,3], index: 5, kind: output, shape index: {0}]   ;;  %s695_s6 = inlined_call_operand.vmem [shape: f32[64,4], index: 6, kind: output, shape index: {1}]   ;;  %s696_s7 = inlined_call_operand.vmem [shape: f32[64,3], index: 7, kind: output, shape index: {2}]   ;;  %s697_s8 = inlined_call_operand.vmem [shape: f32[64,1], index: 8, kind: output, shape index: {3}]   ;;  %s698_s9 = inlined_call_operand.vmem [shape: f32[64,16], index: 9, kind: output, shape index: {4}]  }
   0x1   :  { %v47_v0 = vld [vmem:[%s689_s0] sm:$0xff]  ;;  %v49_v1 = vld [vmem:[%s689_s0 + $0x8] sm:$0xff]  ;;  %v51_v2 = vld [vmem:[%s689_s0 + $0x10] sm:$0xff] }
   0x2   :  { %48 = vst [vmem:[%s694_s5] sm:$0xff] %v47_v0  ;;  %50 = vst [vmem:[%s694_s5 + $0x8] sm:$0xff] %v49_v1  ;;  %v53_v3 = vld [vmem:[%s689_s0 + $0x18] sm:$0xff]  ;;  %v55_v4 = vld [vmem:[%s689_s0 + $0x20] sm:$0xff] }
   0x3   :  { %52 = vst [vmem:[%s694_s5 + $0x10] sm:$0xff] %v51_v2  ;;  %v57_v5 = vld [vmem:[%s689_s0 + $0x28] sm:$0xff]  ;;  %54 = vst [vmem:[%s694_s5 + $0x18] sm:$0xff] %v53_v3  ;;  %v59_v6 = vld [vmem:[%s689_s0 + $0x30] sm:$0xff] }
   0x4   :  { %56 = vst [vmem:[%s694_s5 + $0x20] sm:$0xff] %v55_v4  ;;  %58 = vst [vmem:[%s694_s5 + $0x28] sm:$0xff] %v57_v5  ;;  %v61_v7 = vld [vmem:[%s689_s0 + $0x38] sm:$0xff] }
   0x5   :  { %60 = vst [vmem:[%s694_s5 + $0x30] sm:$0xff] %v59_v6  ;;  %62 = vst [vmem:[%s694_s5 + $0x38] sm:$0xff] %v61_v7 }
   0x6   :  { %70 = vsyncadd [#allocation2], 1024  ;;  %v104_v8 = vld [vmem:[%s690_s1] sm:$0xff]  ;;  %v106_v9 = vld [vmem:[%s690_s1 + $0x8] sm:$0xff] }
   0x7   :  { %105 = vst [vmem:[%s695_s6] sm:$0xff] %v104_v8  ;;  %107 = vst [vmem:[%s695_s6 + $0x8] sm:$0xff] %v106_v9  ;;  %v108_v10 = vld [vmem:[%s690_s1 + $0x10] sm:$0xff]  ;;  %v110_v11 = vld [vmem:[%s690_s1 + $0x18] sm:$0xff] }
   0x8   :  { %v112_v12 = vld [vmem:[%s690_s1 + $0x20] sm:$0xff]  ;;  %109 = vst [vmem:[%s695_s6 + $0x10] sm:$0xff] %v108_v10  ;;  %111 = vst [vmem:[%s695_s6 + $0x18] sm:$0xff] %v110_v11  ;;  %v114_v13 = vld [vmem:[%s690_s1 + $0x28] sm:$0xff] }
   0x9   :  { %113 = vst [vmem:[%s695_s6 + $0x20] sm:$0xff] %v112_v12  ;;  %v116_v14 = vld [vmem:[%s690_s1 + $0x30] sm:$0xff]  ;;  %v118_v15 = vld [vmem:[%s690_s1 + $0x38] sm:$0xff]  ;;  %115 = vst [vmem:[%s695_s6 + $0x28] sm:$0xff] %v114_v13 }
   0xa   :  { %117 = vst [vmem:[%s695_s6 + $0x30] sm:$0xff] %v116_v14  ;;  %119 = vst [vmem:[%s695_s6 + $0x38] sm:$0xff] %v118_v15 }
   0xb   :  { %127 = vsyncadd [#allocation2 + $0x1], 1024  ;;  %v161_v16 = vld [vmem:[%s691_s2] sm:$0xff]  ;;  %v163_v17 = vld [vmem:[%s691_s2 + $0x8] sm:$0xff] }
   0xc   :  { %162 = vst [vmem:[%s696_s7] sm:$0xff] %v161_v16  ;;  %164 = vst [vmem:[%s696_s7 + $0x8] sm:$0xff] %v163_v17  ;;  %v165_v18 = vld [vmem:[%s691_s2 + $0x10] sm:$0xff]  ;;  %v167_v19 = vld [vmem:[%s691_s2 + $0x18] sm:$0xff] }
   0xd   :  { %v169_v20 = vld [vmem:[%s691_s2 + $0x20] sm:$0xff]  ;;  %166 = vst [vmem:[%s696_s7 + $0x10] sm:$0xff] %v165_v18  ;;  %168 = vst [vmem:[%s696_s7 + $0x18] sm:$0xff] %v167_v19  ;;  %v171_v21 = vld [vmem:[%s691_s2 + $0x28] sm:$0xff] }
   0xe   :  { %170 = vst [vmem:[%s696_s7 + $0x20] sm:$0xff] %v169_v20  ;;  %v173_v22 = vld [vmem:[%s691_s2 + $0x30] sm:$0xff]  ;;  %v175_v23 = vld [vmem:[%s691_s2 + $0x38] sm:$0xff]  ;;  %172 = vst [vmem:[%s696_s7 + $0x28] sm:$0xff] %v171_v21 }
   0xf   :  { %174 = vst [vmem:[%s696_s7 + $0x30] sm:$0xff] %v173_v22  ;;  %176 = vst [vmem:[%s696_s7 + $0x38] sm:$0xff] %v175_v23 }
  0x10   :  { %184 = vsyncadd [#allocation2 + $0x2], 1024  ;;  %v218_v24 = vld [vmem:[%s692_s3] sm:$0xff]  ;;  %v220_v25 = vld [vmem:[%s692_s3 + $0x8] sm:$0xff] }
  0x11   :  { %219 = vst [vmem:[%s697_s8] sm:$0xff] %v218_v24  ;;  %221 = vst [vmem:[%s697_s8 + $0x8] sm:$0xff] %v220_v25  ;;  %v222_v26 = vld [vmem:[%s692_s3 + $0x10] sm:$0xff]  ;;  %v224_v27 = vld [vmem:[%s692_s3 + $0x18] sm:$0xff] }
  0x12   :  { %v226_v28 = vld [vmem:[%s692_s3 + $0x20] sm:$0xff]  ;;  %223 = vst [vmem:[%s697_s8 + $0x10] sm:$0xff] %v222_v26  ;;  %225 = vst [vmem:[%s697_s8 + $0x18] sm:$0xff] %v224_v27  ;;  %v228_v29 = vld [vmem:[%s692_s3 + $0x28] sm:$0xff] }
  0x13   :  { %227 = vst [vmem:[%s697_s8 + $0x20] sm:$0xff] %v226_v28  ;;  %v230_v30 = vld [vmem:[%s692_s3 + $0x30] sm:$0xff]  ;;  %v232_v31 = vld [vmem:[%s692_s3 + $0x38] sm:$0xff]  ;;  %229 = vst [vmem:[%s697_s8 + $0x28] sm:$0xff] %v228_v29 }
  0x14   :  { %231 = vst [vmem:[%s697_s8 + $0x30] sm:$0xff] %v230_v30  ;;  %233 = vst [vmem:[%s697_s8 + $0x38] sm:$0xff] %v232_v31 }
  0x15   :  { %241 = vsyncadd [#allocation2 + $0x3], 1024  ;;  %v275_v32 = vld [vmem:[%s693_s4] sm:$0xff]  ;;  %v277_v33 = vld [vmem:[%s693_s4 + $0x8] sm:$0xff] }
  0x16   :  { %276 = vst [vmem:[%s698_s9] sm:$0xff] %v275_v32  ;;  %278 = vst [vmem:[%s698_s9 + $0x8] sm:$0xff] %v277_v33  ;;  %v279_v34 = vld [vmem:[%s693_s4 + $0x10] sm:$0xff]  ;;  %v281_v35 = vld [vmem:[%s693_s4 + $0x18] sm:$0xff] }
  0x17   :  { %v283_v36 = vld [vmem:[%s693_s4 + $0x20] sm:$0xff]  ;;  %280 = vst [vmem:[%s698_s9 + $0x10] sm:$0xff] %v279_v34  ;;  %282 = vst [vmem:[%s698_s9 + $0x18] sm:$0xff] %v281_v35  ;;  %v285_v37 = vld [vmem:[%s693_s4 + $0x28] sm:$0xff] }
  0x18   :  { %284 = vst [vmem:[%s698_s9 + $0x20] sm:$0xff] %v283_v36  ;;  %v287_v38 = vld [vmem:[%s693_s4 + $0x30] sm:$0xff]  ;;  %v289_v39 = vld [vmem:[%s693_s4 + $0x38] sm:$0xff]  ;;  %286 = vst [vmem:[%s698_s9 + $0x28] sm:$0xff] %v285_v37 }
  0x19   :  { %288 = vst [vmem:[%s698_s9 + $0x30] sm:$0xff] %v287_v38  ;;  %290 = vst [vmem:[%s698_s9 + $0x38] sm:$0xff] %v289_v39 }
  0x1a   :  { %298 = vsyncadd [#allocation2 + $0x4], 1024 }
  0x1b   :  { %389 = dma.done.wait [#allocation2], 1024 }
  0x1c   :  { %390 = vsyncadd [#allocation2], 4294966272 }
  0x1d   :  { %391 = dma.done.wait [#allocation2 + $0x1], 1024 }
  0x1e   :  { %392 = vsyncadd [#allocation2 + $0x1], 4294966272 }
  0x1f   :  { %393 = dma.done.wait [#allocation2 + $0x2], 1024 }
  0x20   :  { %394 = vsyncadd [#allocation2 + $0x2], 4294966272 }
  0x21   :  { %395 = dma.done.wait [#allocation2 + $0x3], 1024 }
  0x22   :  { %396 = vsyncadd [#allocation2 + $0x3], 4294966272 }
  0x23   :  { %397 = dma.done.wait [#allocation2 + $0x4], 1024 }
  0x24   :  { %398 = vsyncadd [#allocation2 + $0x4], 4294966272 }
  0x25   :  { %310 = vsyncmov [#allocation2] }
  0x28   :  { %s311_s4 = vpop.sfrf %310 }
  0x29   :  { %p384_p0 = scmp.ne.s32.totalorder %s311_s4, 0 }
  0x2b   :  { %315 = shalt.err (%p384_p0)  }
  0x2c   :  { %317 = vsyncmov [#allocation2 + $0x1] }
  0x2f   :  { %s318_s18 = vpop.sfrf %317 }
  0x30   :  { %p385_p1 = scmp.ne.s32.totalorder %s318_s18, 0 }
  0x32   :  { %322 = shalt.err (%p385_p1)  }
  0x33   :  { %324 = vsyncmov [#allocation2 + $0x2] }
  0x36   :  { %s325_s9 = vpop.sfrf %324 }
  0x37   :  { %p386_p2 = scmp.ne.s32.totalorder %s325_s9, 0 }
  0x39   :  { %329 = shalt.err (%p386_p2)  }
  0x3a   :  { %331 = vsyncmov [#allocation2 + $0x3] }
  0x3d   :  { %s332_s3 = vpop.sfrf %331 }
  0x3e   :  { %p387_p3 = scmp.ne.s32.totalorder %s332_s3, 0 }
  0x40   :  { %336 = shalt.err (%p387_p3)  }
  0x41   :  { %338 = vsyncmov [#allocation2 + $0x4] }
  0x44   :  { %s339_s19 = vpop.sfrf %338 }
  0x45   :  { %p388_p4 = scmp.ne.s32.totalorder %s339_s19, 0 }
  0x47   :  { %343 = shalt.err (%p388_p4)  }

</bundles_post_ra>
